<compile_context>
chip_gen: v7x
topology: tpu7x:2x2x1
jax: 0.10.0
libtpu: 0.0.40
codegen_flags: <defaults>
</compile_context>

<pallas_src>
import functools

import jax
import jax.numpy as jnp
import numpy as np
from jax.experimental import pallas as pl
from jax.experimental.pallas import tpu as pltpu

B_PAD = 8      # f32 sublane granularity
LANE = 128     # vreg lane width


def _round_up(n, m):
    return (n + m - 1) // m * m


def drqn_kernel(x_ref, hc0_ref, slab_ref, out_ref):
    """Whole DRQN forward in one invocation (no grid; everything VMEM-resident).

    x_ref   : (T*B_PAD, S_pad)   time-major input, batch/feature zero-padded
    hc0_ref : (2*B_PAD, H)       rows [0:B_PAD)=h0, rows [B_PAD:2*B_PAD)=c0
    slab_ref: (ROWS, 128)        packed parameters (one DMA):
                rows [0:S_pad)            lanes [0:4H)  : W_comb = W1^T @ W_ih^T
                rows [S_pad:S_pad+H)      lanes [0:4H)  : W_hh^T
                rows [S_pad+H:S_pad+2H)   lanes [0:H)   : W3^T   (fc3, out dim 16 == H)
                rows [S_pad+2H:S_pad+3H)  lanes [0:128) : W4^T lane-padded with zeros
                row  S_pad+3H             lanes [0:4H)  : b_comb
                row  S_pad+3H+1           lanes [0:H)   : b3
                row  S_pad+3H+2           lanes [0:128) : b4 lane-padded with zeros
    out_ref : ((T+1)*B_PAD, 128) rows [0:T*B_PAD) = fc4 output (lane-padded),
                                 rows [T*B_PAD:+B_PAD) = [h_n | c_n | 0] packed
    """
    TB, S_pad = x_ref.shape
    B2, H = hc0_ref.shape
    B = B2 // 2
    T = TB // B
    G = 4 * H

    # ---- Static views into the packed parameter slab (all lane offset 0,
    # all row offsets multiples of 8 -> clean one-time loads).
    r_whh = S_pad
    r_w3 = S_pad + H
    r_w4 = S_pad + 2 * H
    r_b = S_pad + 3 * H
    w_comb = slab_ref[0:S_pad, 0:G]              # fc1 folded into W_ih (exact)
    whh = slab_ref[r_whh:r_whh + H, 0:G]         # (H, 4H)
    w3 = slab_ref[r_w3:r_w3 + H, 0:H]            # (H, 16); fc3 width == H == 16
    w4 = slab_ref[r_w4:r_w4 + H, :]              # (16, 128), zero lane-padded
    b_comb = slab_ref[r_b:r_b + 1, 0:G]          # (1, 4H)
    b3 = slab_ref[r_b + 1:r_b + 2, 0:H]          # (1, 16)
    b4 = slab_ref[r_b + 2:r_b + 3, :]            # (1, 128), zero lane-padded

    # ---- Hoisted, time-invariant input projection: one MXU call covers
    # fc1 + W_ih for every timestep.  Reshape to (T, B, 4H) so the loop picks
    # a whole aligned 8-sublane row group by leading-dim index each step.
    gates_x = (jnp.dot(x_ref[...], w_comb, preferred_element_type=jnp.float32)
               + b_comb).reshape(T, B, G)

    h = hc0_ref[0:B, :]                          # (B_PAD, H)
    c = hc0_ref[B:2 * B, :]

    # ---- Serial recurrence (static unroll; T is small).  Per step only
    # h @ W_hh plus elementwise gate math; h/c and all h_t stay in vregs.
    # TODO(synk): for long sequences switch to lax.fori_loop carrying (h, c);
    # and consider pltpu.matmul_push_rhs/acc_lhs to keep W_hh staged in the MXU
    # across all T steps (on v7x, also accumulate in-place in the MRB).
    hs = []
    for t in range(T):
        gates = gates_x[t] + jnp.dot(h, whh, preferred_element_type=jnp.float32)
        sg = jax.nn.sigmoid(gates)       # one EUP pass covers i/f/o gates
        tg = jnp.tanh(gates)             # one EUP pass covers the g gate
        i_g = sg[:, 0 * H:1 * H]
        f_g = sg[:, 1 * H:2 * H]
        g_g = tg[:, 2 * H:3 * H]
        o_g = sg[:, 3 * H:4 * H]
        c = f_g * c + i_g * g_g
        h = o_g * jnp.tanh(c)
        hs.append(h)

    # ---- Hoisted head over all timesteps at once (no VMEM scratch round-trip).
    hall = jnp.concatenate(hs, axis=0)                                   # (T*B, H)
    h3 = jnp.maximum(
        jnp.dot(hall, w3, preferred_element_type=jnp.float32) + b3, 0.0)
    y = jnp.dot(h3, w4, preferred_element_type=jnp.float32) + b4        # (T*B, 128)

    # ---- Single merged, lane-dense writeback (one output DMA).
    out_ref[0:TB, :] = y                                       # full-width vst
    out_ref[TB:TB + B, :] = jnp.concatenate(
        [h, c, jnp.zeros((B, LANE - 2 * H), jnp.float32)], axis=1)


def prepare_params(params):
    """Fold fc1 into the LSTM input projection and pack every weight/bias into
    one (8,128)-aligned f32 slab.  Call once per parameter update, not per step."""
    w1_t = params["w1_t"]
    S, H = w1_t.shape
    G = 4 * H
    A = params["w4_t"].shape[1]
    S_pad = _round_up(S, B_PAD)

    w_comb = w1_t @ params["wih_t"]                                      # (S, 4H)
    b_comb = params["b1"] @ params["wih_t"] + params["bih"] + params["bhh"]

    rows = _round_up(S_pad + 3 * H + 3, B_PAD)
    slab = jnp.zeros((rows, LANE), jnp.float32)
    slab = slab.at[0:S, 0:G].set(w_comb)
    slab = slab.at[S_pad:S_pad + H, 0:G].set(params["whh_t"])
    slab = slab.at[S_pad + H:S_pad + 2 * H, 0:16].set(params["w3_t"])
    slab = slab.at[S_pad + 2 * H:S_pad + 3 * H, 0:A].set(params["w4_t"])
    r_b = S_pad + 3 * H
    slab = slab.at[r_b, 0:G].set(b_comb[0])
    slab = slab.at[r_b + 1, 0:16].set(params["b3"][0])
    slab = slab.at[r_b + 2, 0:A].set(params["b4"][0])
    return slab


@functools.partial(jax.jit, static_argnames=("action_dim",))
def drqn_forward(x, h0, c0, slab, *, action_dim):
    """x: (T, B, S) f32 time-major; h0, c0: (1, B, H) f32.  Returns (y, (hn, cn))."""
    T, B, S = x.shape
    H = h0.shape[-1]
    S_pad = _round_up(S, B_PAD)

    # Zero-pad batch to 8 sublanes and features to S_pad (exact: padded rows
    # are independent and sliced off; padded feature columns hit zero weights).
    x_pad = jnp.zeros((T, B_PAD, S_pad), jnp.float32).at[:, :B, :S].set(x)
    hc0 = (jnp.zeros((2 * B_PAD, H), jnp.float32)
           .at[:B, :].set(h0[0])
           .at[B_PAD:B_PAD + B, :].set(c0[0]))

    vmem = pl.BlockSpec(memory_space=pltpu.MemorySpace.VMEM)
    out = pl.pallas_call(
        drqn_kernel,
        out_shape=jax.ShapeDtypeStruct(((T + 1) * B_PAD, LANE), jnp.float32),
        in_specs=[vmem, vmem, vmem],
        out_specs=vmem,
    )(x_pad.reshape(T * B_PAD, S_pad), hc0, slab)

    # TODO(synk): at replay-buffer batch sizes (32-512) add a leading batch grid
    # axis marked "parallel" so v7x's two TensorCores split the batch; at B=2 a
    # single invocation is optimal on every generation.
    y = out[:T * B_PAD, :action_dim].reshape(T, B_PAD, action_dim)[:, :B]
    hn = out[T * B_PAD:T * B_PAD + B, 0:H]
    cn = out[T * B_PAD:T * B_PAD + B, H:2 * H]
    return y, (hn[None], cn[None])


def init_params(key, state_dim, action_dim, H=16):
    """Deterministic init mirroring PyTorch default uniform(-1/sqrt(fan_in), +)."""
    ks = jax.random.split(key, 10)

    def unif(k, shape, fan_in):
        bound = 1.0 / np.sqrt(fan_in)
        return jax.random.uniform(k, shape, jnp.float32, -bound, bound)

    # Stored pre-transposed so matmuls are plain x @ W.
    return {
        "w1_t":  unif(ks[0], (state_dim, H), state_dim),      # fc1 (in, out)
        "b1":    unif(ks[1], (1, H), state_dim),
        "wih_t": unif(ks[2], (H, 4 * H), H),                   # LSTM W_ih^T
        "whh_t": unif(ks[3], (H, 4 * H), H),                   # LSTM W_hh^T
        "bih":   unif(ks[4], (1, 4 * H), H),
        "bhh":   unif(ks[5], (1, 4 * H), H),
        "w3_t":  unif(ks[6], (H, 16), H),                      # fc3
        "b3":    unif(ks[7], (1, 16), H),
        "w4_t":  unif(ks[8], (16, action_dim), 16),            # fc4
        "b4":    unif(ks[9], (1, action_dim), 16),
    }
    # NOTE: fc2 exists in the PyTorch __init__ but is unused in forward(); omitted.


def drqn_reference(x, h0, c0, p):
    """Pure-JAX reference with the original (un-folded) PyTorch math."""
    T, B, S = x.shape
    H = h0.shape[-1]
    h = h0[0]
    c = c0[0]
    ys = []
    for t in range(T):
        h1 = x[t] @ p["w1_t"] + p["b1"]
        gates = h1 @ p["wih_t"] + p["bih"] + h @ p["whh_t"] + p["bhh"]
        i = jax.nn.sigmoid(gates[:, 0 * H:1 * H])
        f = jax.nn.sigmoid(gates[:, 1 * H:2 * H])
        g = jnp.tanh(gates[:, 2 * H:3 * H])
        o = jax.nn.sigmoid(gates[:, 3 * H:4 * H])
        c = f * c + i * g
        h = o * jnp.tanh(c)
        h3 = jnp.maximum(h @ p["w3_t"] + p["b3"], 0.0)
        ys.append(h3 @ p["w4_t"] + p["b4"])
    return jnp.stack(ys, 0), (h[None], c[None])


if __name__ == "__main__":
    STATE, ACTION, H = 12, 4, 16
    T, B = 8, 2

    key = jax.random.PRNGKey(0)
    k_p, k_x, k_h, k_c = jax.random.split(key, 4)

    params = init_params(k_p, STATE, ACTION, H)
    slab = prepare_params(params)          # once per parameter update, not per call
    x = jax.random.normal(k_x, (T, B, STATE), jnp.float32)   # (seq, batch, state)
    h0 = jax.random.normal(k_h, (1, B, H), jnp.float32)
    c0 = jax.random.normal(k_c, (1, B, H), jnp.float32)

    (y, (hn, cn)) = drqn_forward(x, h0, c0, slab, action_dim=ACTION)
    jax.block_until_ready((y, hn, cn))

    y_ref, (hn_ref, cn_ref) = drqn_reference(x, h0, c0, params)
    # Slightly looser tolerance: the fc1 fold reassociates the f32 matmuls.
    np.testing.assert_allclose(np.asarray(y), np.asarray(y_ref), rtol=1e-4, atol=1e-4)
    np.testing.assert_allclose(np.asarray(hn), np.asarray(hn_ref), rtol=1e-4, atol=1e-4)
    np.testing.assert_allclose(np.asarray(cn), np.asarray(cn_ref), rtol=1e-4, atol=1e-4)

    print("KERNEL_OK")
</pallas_src>

<mosaic_0001>
module attributes {stable_mosaic.version = 11 : i64} {
  func.func @drqn_kernel(%arg0: memref<64x16xf32, #tpu.memory_space<vmem>>, %arg1: memref<16x16xf32, #tpu.memory_space<vmem>>, %arg2: memref<72x128xf32, #tpu.memory_space<vmem>>, %arg3: memref<72x128xf32, #tpu.memory_space<vmem>>) attributes {dimension_semantics = [], scalar_prefetch = 0 : i64, scratch_operands = 0 : i64, tpu.core_type = #tpu.core_type<tc>} {
    %c0 = arith.constant 0 : index
    %c0_0 = arith.constant 0 : index
    %0 = vector.load %arg2[%c0, %c0_0] : memref<72x128xf32, #tpu.memory_space<vmem>>, vector<16x64xf32>
    %c16 = arith.constant 16 : index
    %c0_1 = arith.constant 0 : index
    %1 = vector.load %arg2[%c16, %c0_1] : memref<72x128xf32, #tpu.memory_space<vmem>>, vector<16x64xf32>
    %c32 = arith.constant 32 : index
    %c0_2 = arith.constant 0 : index
    %2 = vector.load %arg2[%c32, %c0_2] : memref<72x128xf32, #tpu.memory_space<vmem>>, vector<16x16xf32>
    %c48 = arith.constant 48 : index
    %c0_3 = arith.constant 0 : index
    %3 = vector.load %arg2[%c48, %c0_3] : memref<72x128xf32, #tpu.memory_space<vmem>>, vector<16x128xf32>
    %c64 = arith.constant 64 : index
    %c0_4 = arith.constant 0 : index
    %4 = vector.load %arg2[%c64, %c0_4] : memref<72x128xf32, #tpu.memory_space<vmem>>, vector<1x64xf32>
    %c65 = arith.constant 65 : index
    %c0_5 = arith.constant 0 : index
    %5 = vector.load %arg2[%c65, %c0_5] : memref<72x128xf32, #tpu.memory_space<vmem>>, vector<1x16xf32>
    %c66 = arith.constant 66 : index
    %c0_6 = arith.constant 0 : index
    %6 = vector.load %arg2[%c66, %c0_6] : memref<72x128xf32, #tpu.memory_space<vmem>>, vector<1x128xf32>
    %c0_7 = arith.constant 0 : index
    %c0_8 = arith.constant 0 : index
    %7 = vector.load %arg0[%c0_7, %c0_8] : memref<64x16xf32, #tpu.memory_space<vmem>>, vector<64x16xf32>
    %cst = arith.constant dense<0.000000e+00> : vector<64x64xf32>
    %8 = tpu.matmul %7, %0, %cst {dimension_numbers = #tpu.dot_dimension_numbers<[1], [0], [0], [1], [0, 0, 1, 1], [], []>} : vector<64x16xf32>, vector<16x64xf32>, vector<64x64xf32> -> vector<64x64xf32>
    %9 = vector.broadcast %4 : vector<1x64xf32> to vector<64x64xf32>
    %10 = arith.addf %8, %9 : vector<64x64xf32>
    %11 = vector.shape_cast %10 : vector<64x64xf32> to vector<8x8x64xf32>
    %c0_9 = arith.constant 0 : index
    %c0_10 = arith.constant 0 : index
    %12 = vector.load %arg1[%c0_9, %c0_10] : memref<16x16xf32, #tpu.memory_space<vmem>>, vector<8x16xf32>
    %c8 = arith.constant 8 : index
    %c0_11 = arith.constant 0 : index
    %13 = vector.load %arg1[%c8, %c0_11] : memref<16x16xf32, #tpu.memory_space<vmem>>, vector<8x16xf32>
    %14 = vector.extract_strided_slice %11 {offsets = [0, 0, 0], sizes = [1, 8, 64], strides = [1, 1, 1]} : vector<8x8x64xf32> to vector<1x8x64xf32>
    %15 = vector.shape_cast %14 : vector<1x8x64xf32> to vector<8x64xf32>
    %cst_12 = arith.constant dense<0.000000e+00> : vector<8x64xf32>
    %16 = tpu.matmul %12, %1, %cst_12 {dimension_numbers = #tpu.dot_dimension_numbers<[1], [0], [0], [1], [0, 0, 1, 1], [], []>} : vector<8x16xf32>, vector<16x64xf32>, vector<8x64xf32> -> vector<8x64xf32>
    %17 = arith.addf %15, %16 : vector<8x64xf32>
    %18 = arith.negf %17 : vector<8x64xf32>
    %19 = math.exp %18 : vector<8x64xf32>
    %cst_13 = arith.constant 1.000000e+00 : f32
    %20 = vector.broadcast %cst_13 : f32 to vector<8x64xf32>
    %21 = arith.addf %20, %19 : vector<8x64xf32>
    %22 = arith.divf %20, %21 : vector<8x64xf32>
    %23 = math.tanh %17 : vector<8x64xf32>
    %24 = vector.extract_strided_slice %22 {offsets = [0, 0], sizes = [8, 16], strides = [1, 1]} : vector<8x64xf32> to vector<8x16xf32>
    %25 = vector.extract_strided_slice %22 {offsets = [0, 16], sizes = [8, 16], strides = [1, 1]} : vector<8x64xf32> to vector<8x16xf32>
    %26 = vector.extract_strided_slice %23 {offsets = [0, 32], sizes = [8, 16], strides = [1, 1]} : vector<8x64xf32> to vector<8x16xf32>
    %27 = vector.extract_strided_slice %22 {offsets = [0, 48], sizes = [8, 16], strides = [1, 1]} : vector<8x64xf32> to vector<8x16xf32>
    %28 = arith.mulf %25, %13 : vector<8x16xf32>
    %29 = arith.mulf %24, %26 : vector<8x16xf32>
    %30 = arith.addf %28, %29 : vector<8x16xf32>
    %31 = math.tanh %30 : vector<8x16xf32>
    %32 = arith.mulf %27, %31 : vector<8x16xf32>
    %33 = vector.extract_strided_slice %11 {offsets = [1, 0, 0], sizes = [1, 8, 64], strides = [1, 1, 1]} : vector<8x8x64xf32> to vector<1x8x64xf32>
    %34 = vector.shape_cast %33 : vector<1x8x64xf32> to vector<8x64xf32>
    %cst_14 = arith.constant dense<0.000000e+00> : vector<8x64xf32>
    %35 = tpu.matmul %32, %1, %cst_14 {dimension_numbers = #tpu.dot_dimension_numbers<[1], [0], [0], [1], [0, 0, 1, 1], [], []>} : vector<8x16xf32>, vector<16x64xf32>, vector<8x64xf32> -> vector<8x64xf32>
    %36 = arith.addf %34, %35 : vector<8x64xf32>
    %37 = arith.negf %36 : vector<8x64xf32>
    %38 = math.exp %37 : vector<8x64xf32>
    %cst_15 = arith.constant 1.000000e+00 : f32
    %39 = vector.broadcast %cst_15 : f32 to vector<8x64xf32>
    %40 = arith.addf %39, %38 : vector<8x64xf32>
    %41 = arith.divf %39, %40 : vector<8x64xf32>
    %42 = math.tanh %36 : vector<8x64xf32>
    %43 = vector.extract_strided_slice %41 {offsets = [0, 0], sizes = [8, 16], strides = [1, 1]} : vector<8x64xf32> to vector<8x16xf32>
    %44 = vector.extract_strided_slice %41 {offsets = [0, 16], sizes = [8, 16], strides = [1, 1]} : vector<8x64xf32> to vector<8x16xf32>
    %45 = vector.extract_strided_slice %42 {offsets = [0, 32], sizes = [8, 16], strides = [1, 1]} : vector<8x64xf32> to vector<8x16xf32>
    %46 = vector.extract_strided_slice %41 {offsets = [0, 48], sizes = [8, 16], strides = [1, 1]} : vector<8x64xf32> to vector<8x16xf32>
    %47 = arith.mulf %44, %30 : vector<8x16xf32>
    %48 = arith.mulf %43, %45 : vector<8x16xf32>
    %49 = arith.addf %47, %48 : vector<8x16xf32>
    %50 = math.tanh %49 : vector<8x16xf32>
    %51 = arith.mulf %46, %50 : vector<8x16xf32>
    %52 = vector.extract_strided_slice %11 {offsets = [2, 0, 0], sizes = [1, 8, 64], strides = [1, 1, 1]} : vector<8x8x64xf32> to vector<1x8x64xf32>
    %53 = vector.shape_cast %52 : vector<1x8x64xf32> to vector<8x64xf32>
    %cst_16 = arith.constant dense<0.000000e+00> : vector<8x64xf32>
    %54 = tpu.matmul %51, %1, %cst_16 {dimension_numbers = #tpu.dot_dimension_numbers<[1], [0], [0], [1], [0, 0, 1, 1], [], []>} : vector<8x16xf32>, vector<16x64xf32>, vector<8x64xf32> -> vector<8x64xf32>
    %55 = arith.addf %53, %54 : vector<8x64xf32>
    %56 = arith.negf %55 : vector<8x64xf32>
    %57 = math.exp %56 : vector<8x64xf32>
    %cst_17 = arith.constant 1.000000e+00 : f32
    %58 = vector.broadcast %cst_17 : f32 to vector<8x64xf32>
    %59 = arith.addf %58, %57 : vector<8x64xf32>
    %60 = arith.divf %58, %59 : vector<8x64xf32>
    %61 = math.tanh %55 : vector<8x64xf32>
    %62 = vector.extract_strided_slice %60 {offsets = [0, 0], sizes = [8, 16], strides = [1, 1]} : vector<8x64xf32> to vector<8x16xf32>
    %63 = vector.extract_strided_slice %60 {offsets = [0, 16], sizes = [8, 16], strides = [1, 1]} : vector<8x64xf32> to vector<8x16xf32>
    %64 = vector.extract_strided_slice %61 {offsets = [0, 32], sizes = [8, 16], strides = [1, 1]} : vector<8x64xf32> to vector<8x16xf32>
    %65 = vector.extract_strided_slice %60 {offsets = [0, 48], sizes = [8, 16], strides = [1, 1]} : vector<8x64xf32> to vector<8x16xf32>
    %66 = arith.mulf %63, %49 : vector<8x16xf32>
    %67 = arith.mulf %62, %64 : vector<8x16xf32>
    %68 = arith.addf %66, %67 : vector<8x16xf32>
    %69 = math.tanh %68 : vector<8x16xf32>
    %70 = arith.mulf %65, %69 : vector<8x16xf32>
    %71 = vector.extract_strided_slice %11 {offsets = [3, 0, 0], sizes = [1, 8, 64], strides = [1, 1, 1]} : vector<8x8x64xf32> to vector<1x8x64xf32>
    %72 = vector.shape_cast %71 : vector<1x8x64xf32> to vector<8x64xf32>
    %cst_18 = arith.constant dense<0.000000e+00> : vector<8x64xf32>
    %73 = tpu.matmul %70, %1, %cst_18 {dimension_numbers = #tpu.dot_dimension_numbers<[1], [0], [0], [1], [0, 0, 1, 1], [], []>} : vector<8x16xf32>, vector<16x64xf32>, vector<8x64xf32> -> vector<8x64xf32>
    %74 = arith.addf %72, %73 : vector<8x64xf32>
    %75 = arith.negf %74 : vector<8x64xf32>
    %76 = math.exp %75 : vector<8x64xf32>
    %cst_19 = arith.constant 1.000000e+00 : f32
    %77 = vector.broadcast %cst_19 : f32 to vector<8x64xf32>
    %78 = arith.addf %77, %76 : vector<8x64xf32>
    %79 = arith.divf %77, %78 : vector<8x64xf32>
    %80 = math.tanh %74 : vector<8x64xf32>
    %81 = vector.extract_strided_slice %79 {offsets = [0, 0], sizes = [8, 16], strides = [1, 1]} : vector<8x64xf32> to vector<8x16xf32>
    %82 = vector.extract_strided_slice %79 {offsets = [0, 16], sizes = [8, 16], strides = [1, 1]} : vector<8x64xf32> to vector<8x16xf32>
    %83 = vector.extract_strided_slice %80 {offsets = [0, 32], sizes = [8, 16], strides = [1, 1]} : vector<8x64xf32> to vector<8x16xf32>
    %84 = vector.extract_strided_slice %79 {offsets = [0, 48], sizes = [8, 16], strides = [1, 1]} : vector<8x64xf32> to vector<8x16xf32>
    %85 = arith.mulf %82, %68 : vector<8x16xf32>
    %86 = arith.mulf %81, %83 : vector<8x16xf32>
    %87 = arith.addf %85, %86 : vector<8x16xf32>
    %88 = math.tanh %87 : vector<8x16xf32>
    %89 = arith.mulf %84, %88 : vector<8x16xf32>
    %90 = vector.extract_strided_slice %11 {offsets = [4, 0, 0], sizes = [1, 8, 64], strides = [1, 1, 1]} : vector<8x8x64xf32> to vector<1x8x64xf32>
    %91 = vector.shape_cast %90 : vector<1x8x64xf32> to vector<8x64xf32>
    %cst_20 = arith.constant dense<0.000000e+00> : vector<8x64xf32>
    %92 = tpu.matmul %89, %1, %cst_20 {dimension_numbers = #tpu.dot_dimension_numbers<[1], [0], [0], [1], [0, 0, 1, 1], [], []>} : vector<8x16xf32>, vector<16x64xf32>, vector<8x64xf32> -> vector<8x64xf32>
    %93 = arith.addf %91, %92 : vector<8x64xf32>
    %94 = arith.negf %93 : vector<8x64xf32>
    %95 = math.exp %94 : vector<8x64xf32>
    %cst_21 = arith.constant 1.000000e+00 : f32
    %96 = vector.broadcast %cst_21 : f32 to vector<8x64xf32>
    %97 = arith.addf %96, %95 : vector<8x64xf32>
    %98 = arith.divf %96, %97 : vector<8x64xf32>
    %99 = math.tanh %93 : vector<8x64xf32>
    %100 = vector.extract_strided_slice %98 {offsets = [0, 0], sizes = [8, 16], strides = [1, 1]} : vector<8x64xf32> to vector<8x16xf32>
    %101 = vector.extract_strided_slice %98 {offsets = [0, 16], sizes = [8, 16], strides = [1, 1]} : vector<8x64xf32> to vector<8x16xf32>
    %102 = vector.extract_strided_slice %99 {offsets = [0, 32], sizes = [8, 16], strides = [1, 1]} : vector<8x64xf32> to vector<8x16xf32>
    %103 = vector.extract_strided_slice %98 {offsets = [0, 48], sizes = [8, 16], strides = [1, 1]} : vector<8x64xf32> to vector<8x16xf32>
    %104 = arith.mulf %101, %87 : vector<8x16xf32>
    %105 = arith.mulf %100, %102 : vector<8x16xf32>
    %106 = arith.addf %104, %105 : vector<8x16xf32>
    %107 = math.tanh %106 : vector<8x16xf32>
    %108 = arith.mulf %103, %107 : vector<8x16xf32>
    %109 = vector.extract_strided_slice %11 {offsets = [5, 0, 0], sizes = [1, 8, 64], strides = [1, 1, 1]} : vector<8x8x64xf32> to vector<1x8x64xf32>
    %110 = vector.shape_cast %109 : vector<1x8x64xf32> to vector<8x64xf32>
    %cst_22 = arith.constant dense<0.000000e+00> : vector<8x64xf32>
    %111 = tpu.matmul %108, %1, %cst_22 {dimension_numbers = #tpu.dot_dimension_numbers<[1], [0], [0], [1], [0, 0, 1, 1], [], []>} : vector<8x16xf32>, vector<16x64xf32>, vector<8x64xf32> -> vector<8x64xf32>
    %112 = arith.addf %110, %111 : vector<8x64xf32>
    %113 = arith.negf %112 : vector<8x64xf32>
    %114 = math.exp %113 : vector<8x64xf32>
    %cst_23 = arith.constant 1.000000e+00 : f32
    %115 = vector.broadcast %cst_23 : f32 to vector<8x64xf32>
    %116 = arith.addf %115, %114 : vector<8x64xf32>
    %117 = arith.divf %115, %116 : vector<8x64xf32>
    %118 = math.tanh %112 : vector<8x64xf32>
    %119 = vector.extract_strided_slice %117 {offsets = [0, 0], sizes = [8, 16], strides = [1, 1]} : vector<8x64xf32> to vector<8x16xf32>
    %120 = vector.extract_strided_slice %117 {offsets = [0, 16], sizes = [8, 16], strides = [1, 1]} : vector<8x64xf32> to vector<8x16xf32>
    %121 = vector.extract_strided_slice %118 {offsets = [0, 32], sizes = [8, 16], strides = [1, 1]} : vector<8x64xf32> to vector<8x16xf32>
    %122 = vector.extract_strided_slice %117 {offsets = [0, 48], sizes = [8, 16], strides = [1, 1]} : vector<8x64xf32> to vector<8x16xf32>
    %123 = arith.mulf %120, %106 : vector<8x16xf32>
    %124 = arith.mulf %119, %121 : vector<8x16xf32>
    %125 = arith.addf %123, %124 : vector<8x16xf32>
    %126 = math.tanh %125 : vector<8x16xf32>
    %127 = arith.mulf %122, %126 : vector<8x16xf32>
    %128 = vector.extract_strided_slice %11 {offsets = [6, 0, 0], sizes = [1, 8, 64], strides = [1, 1, 1]} : vector<8x8x64xf32> to vector<1x8x64xf32>
    %129 = vector.shape_cast %128 : vector<1x8x64xf32> to vector<8x64xf32>
    %cst_24 = arith.constant dense<0.000000e+00> : vector<8x64xf32>
    %130 = tpu.matmul %127, %1, %cst_24 {dimension_numbers = #tpu.dot_dimension_numbers<[1], [0], [0], [1], [0, 0, 1, 1], [], []>} : vector<8x16xf32>, vector<16x64xf32>, vector<8x64xf32> -> vector<8x64xf32>
    %131 = arith.addf %129, %130 : vector<8x64xf32>
    %132 = arith.negf %131 : vector<8x64xf32>
    %133 = math.exp %132 : vector<8x64xf32>
    %cst_25 = arith.constant 1.000000e+00 : f32
    %134 = vector.broadcast %cst_25 : f32 to vector<8x64xf32>
    %135 = arith.addf %134, %133 : vector<8x64xf32>
    %136 = arith.divf %134, %135 : vector<8x64xf32>
    %137 = math.tanh %131 : vector<8x64xf32>
    %138 = vector.extract_strided_slice %136 {offsets = [0, 0], sizes = [8, 16], strides = [1, 1]} : vector<8x64xf32> to vector<8x16xf32>
    %139 = vector.extract_strided_slice %136 {offsets = [0, 16], sizes = [8, 16], strides = [1, 1]} : vector<8x64xf32> to vector<8x16xf32>
    %140 = vector.extract_strided_slice %137 {offsets = [0, 32], sizes = [8, 16], strides = [1, 1]} : vector<8x64xf32> to vector<8x16xf32>
    %141 = vector.extract_strided_slice %136 {offsets = [0, 48], sizes = [8, 16], strides = [1, 1]} : vector<8x64xf32> to vector<8x16xf32>
    %142 = arith.mulf %139, %125 : vector<8x16xf32>
    %143 = arith.mulf %138, %140 : vector<8x16xf32>
    %144 = arith.addf %142, %143 : vector<8x16xf32>
    %145 = math.tanh %144 : vector<8x16xf32>
    %146 = arith.mulf %141, %145 : vector<8x16xf32>
    %147 = vector.extract_strided_slice %11 {offsets = [7, 0, 0], sizes = [1, 8, 64], strides = [1, 1, 1]} : vector<8x8x64xf32> to vector<1x8x64xf32>
    %148 = vector.shape_cast %147 : vector<1x8x64xf32> to vector<8x64xf32>
    %cst_26 = arith.constant dense<0.000000e+00> : vector<8x64xf32>
    %149 = tpu.matmul %146, %1, %cst_26 {dimension_numbers = #tpu.dot_dimension_numbers<[1], [0], [0], [1], [0, 0, 1, 1], [], []>} : vector<8x16xf32>, vector<16x64xf32>, vector<8x64xf32> -> vector<8x64xf32>
    %150 = arith.addf %148, %149 : vector<8x64xf32>
    %151 = arith.negf %150 : vector<8x64xf32>
    %152 = math.exp %151 : vector<8x64xf32>
    %cst_27 = arith.constant 1.000000e+00 : f32
    %153 = vector.broadcast %cst_27 : f32 to vector<8x64xf32>
    %154 = arith.addf %153, %152 : vector<8x64xf32>
    %155 = arith.divf %153, %154 : vector<8x64xf32>
    %156 = math.tanh %150 : vector<8x64xf32>
    %157 = vector.extract_strided_slice %155 {offsets = [0, 0], sizes = [8, 16], strides = [1, 1]} : vector<8x64xf32> to vector<8x16xf32>
    %158 = vector.extract_strided_slice %155 {offsets = [0, 16], sizes = [8, 16], strides = [1, 1]} : vector<8x64xf32> to vector<8x16xf32>
    %159 = vector.extract_strided_slice %156 {offsets = [0, 32], sizes = [8, 16], strides = [1, 1]} : vector<8x64xf32> to vector<8x16xf32>
    %160 = vector.extract_strided_slice %155 {offsets = [0, 48], sizes = [8, 16], strides = [1, 1]} : vector<8x64xf32> to vector<8x16xf32>
    %161 = arith.mulf %158, %144 : vector<8x16xf32>
    %162 = arith.mulf %157, %159 : vector<8x16xf32>
    %163 = arith.addf %161, %162 : vector<8x16xf32>
    %164 = math.tanh %163 : vector<8x16xf32>
    %165 = arith.mulf %160, %164 : vector<8x16xf32>
    %166 = tpu.concatenate %32, %51, %70, %89, %108, %127, %146, %165 in 0 : vector<8x16xf32>, vector<8x16xf32>, vector<8x16xf32>, vector<8x16xf32>, vector<8x16xf32>, vector<8x16xf32>, vector<8x16xf32>, vector<8x16xf32> -> vector<64x16xf32>
    %cst_28 = arith.constant dense<0.000000e+00> : vector<64x16xf32>
    %167 = tpu.matmul %166, %2, %cst_28 {dimension_numbers = #tpu.dot_dimension_numbers<[1], [0], [0], [1], [0, 0, 1, 1], [], []>} : vector<64x16xf32>, vector<16x16xf32>, vector<64x16xf32> -> vector<64x16xf32>
    %168 = vector.broadcast %5 : vector<1x16xf32> to vector<64x16xf32>
    %169 = arith.addf %167, %168 : vector<64x16xf32>
    %cst_29 = arith.constant 0.000000e+00 : f32
    %170 = vector.broadcast %cst_29 : f32 to vector<64x16xf32>
    %171 = arith.maximumf %169, %170 : vector<64x16xf32>
    %cst_30 = arith.constant dense<0.000000e+00> : vector<64x128xf32>
    %172 = tpu.matmul %171, %3, %cst_30 {dimension_numbers = #tpu.dot_dimension_numbers<[1], [0], [0], [1], [0, 0, 1, 1], [], []>} : vector<64x16xf32>, vector<16x128xf32>, vector<64x128xf32> -> vector<64x128xf32>
    %173 = vector.broadcast %6 : vector<1x128xf32> to vector<64x128xf32>
    %174 = arith.addf %172, %173 : vector<64x128xf32>
    %c0_31 = arith.constant 0 : index
    %c0_32 = arith.constant 0 : index
    %175 = vector.load %arg3[%c0_31, %c0_32] : memref<72x128xf32, #tpu.memory_space<vmem>>, vector<64x128xf32>
    tpu.vector_store %arg3[%c0_31, %c0_32], %174 {strides = array<i32>} : memref<72x128xf32, #tpu.memory_space<vmem>>, vector<64x128xf32>,
    %cst_33 = arith.constant 0.000000e+00 : f32
    %176 = vector.broadcast %cst_33 : f32 to vector<8x96xf32>
    %177 = tpu.concatenate %165, %163, %176 in 1 : vector<8x16xf32>, vector<8x16xf32>, vector<8x96xf32> -> vector<8x128xf32>
    %c64_34 = arith.constant 64 : index
    %c0_35 = arith.constant 0 : index
    %178 = vector.load %arg3[%c64_34, %c0_35] : memref<72x128xf32, #tpu.memory_space<vmem>>, vector<8x128xf32>
    tpu.vector_store %arg3[%c64_34, %c0_35], %177 {strides = array<i32>} : memref<72x128xf32, #tpu.memory_space<vmem>>, vector<8x128xf32>,
    return
  }
}

</mosaic_0001>

<bundles_post_ra>
// kernel: drqn_forward.1
= control target key start
LH: loop header
LB: loop body
LE: loop exit
PB: predicated region body
PF: predicated region fallthrough
CT: control target
= control target key end

     0   :  { %vm37_vm0 = vcmask 130048   ;;  %v1551_v2 = vmov 0.0|0.0   ;;  %vm1552_vm1 = vmmov 0   ;;  %v1553_v4 = vmov 0.0   ;;  %s1554_s28 = smov 96   ;;  %s1555_s4 = smov 16   ;;  %s1814_s2 = inlined_call_operand.vmem [shape: f32[72,128], index: 2, kind: input, shape index: {}]   ;;  %s1815_s0 = inlined_call_operand.vmem [shape: f32[64,16], index: 0, kind: input, shape index: {}]   ;;  %s1816_s1 = inlined_call_operand.vmem [shape: f32[16,16], index: 1, kind: input, shape index: {}]   ;;  %s1817_s3 = inlined_call_operand.vmem [shape: f32[72,128], index: 3, kind: output, shape index: {}]  }
   0x1   :  { %v14_v0 = vld [vmem:[%s1814_s2] sm:$0xff]  ;;  %v15_v1 = vld [vmem:[%s1814_s2 + $0x8] sm:$0xff]  ;;  %1448 = vmatprep.subr.bf16.mxu1 %v1551_v2  ;;  %1360 = vmatprep.mubr.msk.f32.mxu1 %vm1552_vm1, %v1553_v4  ;;  %v16_v6 = vld [vmem:[%s1814_s2 + $0x10] sm:$0xff]  ;;  %s1557_s5 = smov 80   ;;  %vm1236_vm2 = vcmask 261120  }
   0x2   :  { %v25_v3 = vld [vmem:[%s1815_s0] sm:$0xff]  ;;  %v1444_v5 = vpack.c.bf16 %v15_v1, %v14_v0  ;;  %v17_v7 = vld [vmem:[%s1814_s2 + $0x18] sm:$0xff]  ;;  %v26_v9 = vld [vmem:[%s1815_s0 + $0x8] sm:$0xff] }
   0x3   :  { %1344 = vmatprep.mubr.msk.f32.mxu0 %vm37_vm0, %v25_v3  ;;  %v1597_v8 = vpack.c.bf16 %v17_v7, %v16_v6  ;;  %v167_v10 = vld [vmem:[%s1816_s1] sm:$0xff]  ;;  %v168_v19 = vld [vmem:[%s1816_s1 + $0x8] sm:$0xff]  ;;  %s1556_s1 = smov 32   ;;  %v27_v48 = vld [vmem:[%s1815_s0 + $0x10] sm:$0xff] }
   0x4   :  { %1445 = vmatprep.subr.bf16.mxu0 %v1444_v5  ;;  %v1619_v11 = vld [vmem:[%s1814_s2 + $0x40] ss:$0 sm:$0xff]  ;;  %v28_v49 = vld [vmem:[%s1815_s0 + $0x18] sm:$0xff] }
   0x5   :  { %1447 = vmatpush3.bf16.msra.mxu0 %v1444_v5  ;;  %1450 = vmatpush3.bf16.msra.mxu1 %v1597_v8 }
   0x6   :  { %1451 = vmatprep.subr.bf16.mxu1 %v1551_v2  ;;  %1460 = vmatprep.subr.bf16.mxu0 %v1551_v2 }
   0x8   :  { %1345 = vmatmul.mubr.msk.f32.vlgmr.msra.gmra.mrb[0].mxu0 %vm37_vm0, %v26_v9  ;;  %1361 = vmatmul.mubr.msk.f32.vlgmr.msra.gmra.mrb[0].mxu1 %vm37_vm0, %v167_v10 }
   0x9   :  { %1453 = vmatpush3.bf16.msra.mxu1 %v1597_v8  ;;  %1367 = vmatprep.mubr.msk.f32.mxu1 %vm1552_vm1, %v1553_v4 }
   0xa   :  { %1454 = vmatprep.subr.bf16.mxu1 %v1551_v2  ;;  %1462 = vmatpush3.bf16.msra.mxu0 %v1597_v8 }
   0xb   :  { %1466 = vmatprep.subr.bf16.mxu0 %v1551_v2  ;;  %1347 = vmatprep.mubr.msk.f32.mxu0 %vm37_vm0, %v27_v48 }
   0xc   :  { %1348 = vmatmul.mubr.msk.f32.gmra.mrb[2].mxu0 %vm37_vm0, %v28_v49 }
  0xdb   :  { %v1346_v12 = vpop.f32.mrb[0].mxu0  ;;  %v238_v13 = vpop.f32.mrb[0].mxu1 }
  0xdc   :  { %v128_v14 = vpop.f32.mrb[1].mxu0  ;;  %v1362_v15 = vpop.f32.mrb[1].mxu1  ;;  %v134_v34 = vadd.f32 %v1346_v12, %v1619_v11 }
  0xdd   :  { %v129_v16 = vadd.f32 %v1619_v11, %v128_v14 }
  0xdf   :  { %v242_v17 = vadd.f32 %v238_v13, %v129_v16  ;;  %v1349_v53 = vpop.f32.mrb[2].mxu0 }
  0xe0   :  { %v138_v54 = vpop.f32.mrb[3].mxu0  ;;  %v144_v14 = vadd.f32 %v1349_v53, %v1619_v11 }
  0xe1   :  { %1487 = vtanh.f32 %v242_v17  ;;  %v1253_v20 = vmul.f32 -1.442695, %v242_v17  ;;  %v139_v56 = vadd.f32 %v1619_v11, %v138_v54 }
  0xe3   :  { %1489 = vpow2.f32 %v1253_v20 }
  0xeb   :  { %v1488_v18 = vpop.eup %1487 }
  0xec   :  { %256 = vrot.lane.b32.xlu0 %v1488_v18, %s1554_s28 }
  0xed   :  { %v1490_v21 = vpop.eup %1489 }
  0xee   :  { %v246_v22 = vadd.f32 1.0, %v1490_v21 }
  0xf0   :  { %251 = vrot.lane.b32.xlu0 %v168_v19, %s1555_s4  ;;  %1491 = vrcp.f32 %v246_v22 }
  0xfa   :  { %v1492_v23 = vpop.eup %1491 }
 0x15e   :  { %v257_v24 = vpop.permute.xlu0 %256 }
 0x15f   :  { %v259_v25 = vmul.f32 %v1492_v23, %v257_v24 }
 0x161   :  { %261 = vrot.lane.b32.xlu1 %v259_v25, %s1555_s4 }
 0x162   :  { %v252_v26 = vpop.permute.xlu0 %251 }
 0x163   :  { %v254_v27 = vmul.f32 %v1492_v23, %v252_v26 }
 0x1d3   :  { %v262_v28 = vpop.permute.xlu1 %261 }
 0x1d4   :  { %v264_v29 = vadd.f32 %v262_v28, %v254_v27  ;;  %v29_v27 = vld [vmem:[%s1815_s0 + $0x20] sm:$0xff]  ;;  %v30_v28 = vld [vmem:[%s1815_s0 + $0x28] sm:$0xff] }
 0x1d5   :  { %1350 = vmatprep.mubr.msk.f32.mxu0 %vm37_vm0, %v29_v27 }
 0x1d6   :  { %1493 = vtanh.f32 %v264_v29  ;;  %1351 = vmatmul.mubr.msk.f32.gmra.mrb[4].mxu0 %vm37_vm0, %v30_v28 }
 0x1e0   :  { %v1494_v30 = vpop.eup %1493 }
 0x1e1   :  { %267 = vrot.lane.b32.xlu1 %v1494_v30, %s1556_s1  ;;  %v32_v30 = vld [vmem:[%s1815_s0 + $0x38] sm:$0xff] }
 0x253   :  { %v268_v31 = vpop.permute.xlu1 %267 }
 0x254   :  { %v270_v32 = vmul.f32 %v1492_v23, %v268_v31 }
 0x256   :  { %272 = vrot.lane.b32.xlu0 %v270_v32, %s1557_s5 }
 0x2c8   :  { %v1630_v33 = vpop.permute.xlu0 %272 }
 0x2c9   :  { %1368 = vmatmul.mubr.msk.f32.vlgmr.msra.gmra.mrb[2].mxu1 %vm37_vm0, %v1630_v33 }
 0x2ca   :  { %1456 = vmatpush3.bf16.msra.mxu1 %v1597_v8  ;;  %1374 = vmatprep.mubr.msk.f32.mxu1 %vm1552_vm1, %v1553_v4 }
 0x2cb   :  { %1457 = vmatprep.subr.bf16.mxu1 %v1551_v2 }
 0x39c   :  { %v342_v35 = vpop.f32.mrb[2].mxu1 }
 0x39d   :  { %v346_v36 = vadd.f32 %v342_v35, %v134_v34  ;;  %v1369_v37 = vpop.f32.mrb[3].mxu1  ;;  %v1352_v35 = vpop.f32.mrb[4].mxu0 }
 0x39f   :  { %1495 = vtanh.f32 %v346_v36  ;;  %v1255_v39 = vmul.f32 -1.442695, %v346_v36  ;;  %v148_v36 = vpop.f32.mrb[5].mxu0 }
 0x3a1   :  { %1497 = vpow2.f32 %v1255_v39 }
 0x3a9   :  { %v1496_v38 = vpop.eup %1495 }
 0x3aa   :  { %356 = vrot.lane.b32.xlu1 %v1496_v38, %s1554_s28 }
 0x3ab   :  { %v1498_v40 = vpop.eup %1497 }
 0x3ac   :  { %v350_v41 = vadd.f32 1.0, %v1498_v40  ;;  %v149_v40 = vadd.f32 %v1619_v11, %v148_v36 }
 0x3ae   :  { %1499 = vrcp.f32 %v350_v41 }
 0x3b8   :  { %v1500_v42 = vpop.eup %1499 }
 0x3b9   :  { %v354_v45 = vmul.f32 %v1500_v42, %v264_v29  ;;  %v31_v29 = vld [vmem:[%s1815_s0 + $0x30] sm:$0xff] }
 0x3ba   :  { %1353 = vmatprep.mubr.msk.f32.mxu0 %vm37_vm0, %v31_v29 }
 0x3bb   :  { %1354 = vmatmul.mubr.msk.f32.gmra.mrb[6].mxu0 %vm37_vm0, %v32_v30 }
 0x3bc   :  { %1388 = vmatprep.mubr.msk.f32.mxu0 %vm1552_vm1, %v1553_v4 }
 0x41c   :  { %v357_v43 = vpop.permute.xlu1 %356 }
 0x41d   :  { %v359_v44 = vmul.f32 %v1500_v42, %v357_v43 }
 0x41f   :  { %361 = vrot.lane.b32.xlu0 %v359_v44, %s1555_s4 }
 0x48e   :  { %v1695_v37 = vpop.f32.mrb[6].mxu0 }
 0x48f   :  { %v1697_v38 = vpop.f32.mrb[7].mxu0 }
 0x491   :  { %v362_v46 = vpop.permute.xlu0 %361 }
 0x492   :  { %v364_v47 = vadd.f32 %v362_v46, %v354_v45 }
 0x494   :  { %1501 = vtanh.f32 %v364_v47 }
 0x49e   :  { %v1502_v50 = vpop.eup %1501 }
 0x49f   :  { %367 = vrot.lane.b32.xlu1 %v1502_v50, %s1556_s1 }
 0x511   :  { %v368_v51 = vpop.permute.xlu1 %367 }
 0x512   :  { %v370_v52 = vmul.f32 %v1500_v42, %v368_v51 }
 0x514   :  { %372 = vrot.lane.b32.xlu0 %v370_v52, %s1557_s5 }
 0x586   :  { %v1651_v55 = vpop.permute.xlu0 %372 }
 0x587   :  { %1375 = vmatmul.mubr.msk.f32.vlgmr.msra.gmra.mrb[4].mxu1 %vm37_vm0, %v1651_v55 }
 0x588   :  { %1459 = vmatpush3.bf16.msra.mxu1 %v1597_v8  ;;  %1381 = vmatprep.mubr.msk.f32.mxu1 %vm1552_vm1, %v1553_v4 }
 0x589   :  { %1463 = vmatprep.subr.bf16.mxu1 %v1551_v2 }
 0x65a   :  { %v442_v57 = vpop.f32.mrb[4].mxu1 }
 0x65b   :  { %v446_v58 = vadd.f32 %v442_v57, %v139_v56  ;;  %v1376_v59 = vpop.f32.mrb[5].mxu1 }
 0x65c   :  { %v154_v59 = vadd.f32 %v1352_v35, %v1619_v11 }
 0x65d   :  { %1503 = vtanh.f32 %v446_v58  ;;  %v1257_v61 = vmul.f32 -1.442695, %v446_v58 }
 0x65f   :  { %1505 = vpow2.f32 %v1257_v61 }
 0x667   :  { %v1504_v60 = vpop.eup %1503 }
 0x668   :  { %456 = vrot.lane.b32.xlu1 %v1504_v60, %s1554_s28 }
 0x669   :  { %v1506_v62 = vpop.eup %1505 }
 0x66a   :  { %v450_v63 = vadd.f32 1.0, %v1506_v62 }
 0x66c   :  { %1507 = vrcp.f32 %v450_v63 }
 0x676   :  { %v1508_v0 = vpop.eup %1507 }
 0x677   :  { %v454_v5 = vmul.f32 %v1508_v0, %v364_v47 }
 0x6da   :  { %v457_v1 = vpop.permute.xlu1 %456 }
 0x6db   :  { %v459_v3 = vmul.f32 %v1508_v0, %v457_v1 }
 0x6dd   :  { %461 = vrot.lane.b32.xlu0 %v459_v3, %s1555_s4 }
 0x74f   :  { %v462_v6 = vpop.permute.xlu0 %461 }
 0x750   :  { %v464_v7 = vadd.f32 %v462_v6, %v454_v5 }
 0x752   :  { %1509 = vtanh.f32 %v464_v7 }
 0x75c   :  { %v1510_v9 = vpop.eup %1509 }
 0x75d   :  { %467 = vrot.lane.b32.xlu1 %v1510_v9, %s1556_s1 }
 0x7cf   :  { %v468_v10 = vpop.permute.xlu1 %467 }
 0x7d0   :  { %v470_v12 = vmul.f32 %v1508_v0, %v468_v10 }
 0x7d2   :  { %472 = vrot.lane.b32.xlu0 %v470_v12, %s1557_s5  ;;  %v18_v12 = vld [vmem:[%s1814_s2 + $0x20] sm:$0xff] }
 0x844   :  { %v1664_v13 = vpop.permute.xlu0 %472 }
 0x845   :  { %1382 = vmatmul.mubr.msk.f32.vlgmr.msra.gmra.mrb[6].mxu1 %vm37_vm0, %v1664_v13 }
 0x846   :  { %1465 = vmatpush3.bf16.msra.mxu1 %v1597_v8  ;;  %1395 = vmatprep.mubr.msk.f32.mxu1 %vm1552_vm1, %v1553_v4 }
 0x847   :  { %1469 = vmatprep.subr.bf16.mxu1 %v1551_v2 }
 0x918   :  { %v542_v15 = vpop.f32.mrb[6].mxu1 }
 0x919   :  { %v546_v16 = vadd.f32 %v542_v15, %v144_v14  ;;  %v1383_v17 = vpop.f32.mrb[7].mxu1  ;;  %v19_v14 = vld [vmem:[%s1814_s2 + $0x28] sm:$0xff] }
 0x91a   :  { %v1472_v15 = vpack.c.bf16 %v19_v14, %v18_v12 }
 0x91b   :  { %1511 = vtanh.f32 %v546_v16  ;;  %v1259_v19 = vmul.f32 -1.442695, %v546_v16 }
 0x91d   :  { %1513 = vpow2.f32 %v1259_v19  ;;  %v159_v19 = vadd.f32 %v1619_v11, %v1697_v38  ;;  %v20_v38 = vld [vmem:[%s1814_s2 + $0x30] sm:$0xff] }
 0x925   :  { %v1512_v18 = vpop.eup %1511 }
 0x926   :  { %556 = vrot.lane.b32.xlu1 %v1512_v18, %s1554_s28 }
 0x927   :  { %v1514_v20 = vpop.eup %1513 }
 0x928   :  { %v550_v21 = vadd.f32 1.0, %v1514_v20 }
 0x92a   :  { %1515 = vrcp.f32 %v550_v21 }
 0x934   :  { %v1516_v22 = vpop.eup %1515 }
 0x935   :  { %v554_v2 = vmul.f32 %v1516_v22, %v464_v7 }
 0x998   :  { %v557_v23 = vpop.permute.xlu1 %556 }
 0x999   :  { %v559_v24 = vmul.f32 %v1516_v22, %v557_v23 }
 0x99b   :  { %561 = vrot.lane.b32.xlu0 %v559_v24, %s1555_s4 }
 0xa0d   :  { %v562_v25 = vpop.permute.xlu0 %561 }
 0xa0e   :  { %v564_v26 = vadd.f32 %v562_v25, %v554_v2 }
 0xa10   :  { %1517 = vtanh.f32 %v564_v26 }
 0xa1a   :  { %v1518_v31 = vpop.eup %1517 }
 0xa1b   :  { %567 = vrot.lane.b32.xlu1 %v1518_v31, %s1556_s1 }
 0xa8d   :  { %v568_v32 = vpop.permute.xlu1 %567 }
 0xa8e   :  { %v570_v34 = vmul.f32 %v1516_v22, %v568_v32 }
 0xa90   :  { %572 = vrot.lane.b32.xlu0 %v570_v34, %s1557_s5 }
 0xb02   :  { %v1699_v39 = vpop.permute.xlu0 %572 }
 0xb03   :  { %1389 = vmatmul.mubr.msk.f32.vlgmr.msra.gmra.mrb[8].mxu0 %vm37_vm0, %v1699_v39 }
 0xb04   :  { %1468 = vmatpush3.bf16.msra.mxu0 %v1597_v8  ;;  %1402 = vmatprep.mubr.msk.f32.mxu0 %vm1552_vm1, %v1553_v4 }
 0xb05   :  { %1473 = vmatprep.subr.bf16.mxu0 %v1472_v15 }
 0xbd6   :  { %v642_v41 = vpop.f32.mrb[8].mxu0 }
 0xbd7   :  { %v646_v42 = vadd.f32 %v642_v41, %v149_v40  ;;  %v1390_v43 = vpop.f32.mrb[9].mxu0 }
 0xbd8   :  { %v1755_v43 = vld [vmem:[%s1814_s2 + $0x41] ss:$0 sm:$0xff] }
 0xbd9   :  { %1519 = vtanh.f32 %v646_v42  ;;  %v1261_v45 = vmul.f32 -1.442695, %v646_v42 }
 0xbdb   :  { %1521 = vpow2.f32 %v1261_v45 }
 0xbe3   :  { %v1520_v44 = vpop.eup %1519 }
 0xbe4   :  { %656 = vrot.lane.b32.xlu1 %v1520_v44, %s1554_s28 }
 0xbe5   :  { %v1522_v46 = vpop.eup %1521 }
 0xbe6   :  { %v650_v47 = vadd.f32 1.0, %v1522_v46 }
 0xbe8   :  { %1523 = vrcp.f32 %v650_v47 }
 0xbf2   :  { %v1524_v48 = vpop.eup %1523 }
 0xbf3   :  { %v654_v51 = vmul.f32 %v1524_v48, %v564_v26 }
 0xc56   :  { %v657_v49 = vpop.permute.xlu1 %656 }
 0xc57   :  { %v659_v50 = vmul.f32 %v1524_v48, %v657_v49 }
 0xc59   :  { %661 = vrot.lane.b32.xlu0 %v659_v50, %s1555_s4 }
 0xccb   :  { %v662_v52 = vpop.permute.xlu0 %661 }
 0xccc   :  { %v664_v53 = vadd.f32 %v662_v52, %v654_v51 }
 0xcce   :  { %1525 = vtanh.f32 %v664_v53 }
 0xcd8   :  { %v1526_v54 = vpop.eup %1525 }
 0xcd9   :  { %667 = vrot.lane.b32.xlu1 %v1526_v54, %s1556_s1 }
 0xd4b   :  { %v668_v56 = vpop.permute.xlu1 %667 }
 0xd4c   :  { %v670_v57 = vmul.f32 %v1524_v48, %v668_v56 }
 0xd4e   :  { %672 = vrot.lane.b32.xlu0 %v670_v57, %s1557_s5 }
 0xdc0   :  { %v673_v58 = vpop.permute.xlu0 %672 }
 0xdc1   :  { %1396 = vmatmul.mubr.msk.f32.vlgmr.msra.gmra.mrb[8].mxu1 %vm37_vm0, %v673_v58 }
 0xdc2   :  { %1471 = vmatpush3.bf16.msra.mxu1 %v1597_v8  ;;  %1409 = vmatprep.mubr.msk.f32.mxu1 %vm1552_vm1, %v1553_v4 }
 0xe94   :  { %v742_v60 = vpop.f32.mrb[8].mxu1 }
 0xe95   :  { %v746_v61 = vadd.f32 %v742_v60, %v154_v59  ;;  %v1397_v62 = vpop.f32.mrb[9].mxu1 }
 0xe96   :  { %v1277_v62 = vld [vmem:[%s1814_s2 + $0x42] ss:$0 sm:$0xff] }
 0xe97   :  { %1527 = vtanh.f32 %v746_v61  ;;  %v1263_v0 = vmul.f32 -1.442695, %v746_v61 }
 0xe99   :  { %1529 = vpow2.f32 %v1263_v0 }
 0xea1   :  { %v1528_v63 = vpop.eup %1527 }
 0xea2   :  { %756 = vrot.lane.b32.xlu1 %v1528_v63, %s1554_s28 }
 0xea3   :  { %v1530_v1 = vpop.eup %1529 }
 0xea4   :  { %v750_v3 = vadd.f32 1.0, %v1530_v1 }
 0xea6   :  { %1531 = vrcp.f32 %v750_v3 }
 0xeb0   :  { %v1532_v5 = vpop.eup %1531 }
 0xeb1   :  { %v754_v4 = vmul.f32 %v1532_v5, %v664_v53 }
 0xf14   :  { %v757_v6 = vpop.permute.xlu1 %756 }
 0xf15   :  { %v759_v8 = vmul.f32 %v1532_v5, %v757_v6 }
 0xf17   :  { %761 = vrot.lane.b32.xlu0 %v759_v8, %s1555_s4 }
 0xf89   :  { %v762_v7 = vpop.permute.xlu0 %761 }
 0xf8a   :  { %v764_v9 = vadd.f32 %v762_v7, %v754_v4 }
 0xf8c   :  { %1533 = vtanh.f32 %v764_v9 }
 0xf96   :  { %v1534_v10 = vpop.eup %1533 }
 0xf97   :  { %767 = vrot.lane.b32.xlu1 %v1534_v10, %s1556_s1 }
0x1009   :  { %v768_v16 = vpop.permute.xlu1 %767 }
0x100a   :  { %v770_v17 = vmul.f32 %v1532_v5, %v768_v16 }
0x100c   :  { %772 = vrot.lane.b32.xlu0 %v770_v17, %s1557_s5 }
0x107e   :  { %v773_v18 = vpop.permute.xlu0 %772 }
0x107f   :  { %1403 = vmatmul.mubr.msk.f32.vlgmr.msra.gmra.mrb[10].mxu0 %vm37_vm0, %v773_v18 }
0x1080   :  { %1475 = vmatpush3.bf16.msra.mxu0 %v1472_v15  ;;  %1416 = vmatprep.mubr.msk.f32.mxu0 %vm37_vm0, %v1630_v33 }
0x1083   :  { %1417 = vmatmul.mubr.msk.f32.vlgmr.msra.gmra.mrb[12].mxu0 %vm37_vm0, %v1651_v55 }
0x1084   :  { %1419 = vmatprep.mubr.msk.f32.mxu0 %vm37_vm0, %v1664_v13 }
0x1087   :  { %1420 = vmatmul.mubr.msk.f32.gmra.mrb[14].mxu0 %vm37_vm0, %v1699_v39  ;;  %v21_v39 = vld [vmem:[%s1814_s2 + $0x38] sm:$0xff] }
0x1088   :  { %1422 = vmatprep.mubr.msk.f32.mxu0 %vm37_vm0, %v673_v58  ;;  %v1476_v40 = vpack.c.bf16 %v21_v39, %v20_v38  ;;  %v164_v58 = vadd.f32 %v1695_v37, %v1619_v11 }
0x108a   :  { %1477 = vmatprep.subr.bf16.mxu1 %v1476_v40 }
0x108b   :  { %1423 = vmatmul.mubr.msk.f32.gmra.mrb[16].mxu0 %vm37_vm0, %v773_v18 }
0x1152   :  { %v842_v20 = vpop.f32.mrb[10].mxu0 }
0x1153   :  { %v846_v21 = vadd.f32 %v842_v20, %v159_v19  ;;  %v1404_v22 = vpop.f32.mrb[11].mxu0 }
0x1155   :  { %1535 = vtanh.f32 %v846_v21  ;;  %v1265_v26 = vmul.f32 -1.442695, %v846_v21 }
0x1156   :  { %v1418_v33 = vpop.f32.mrb[12].mxu0 }
0x1157   :  { %v1046_v23 = vpop.f32.mrb[13].mxu0  ;;  %1537 = vpow2.f32 %v1265_v26  ;;  %v1052_v45 = vadd.f32 %v1418_v33, %v1755_v43 }
0x1158   :  { %v1047_v44 = vadd.f32 %v1755_v43, %v1046_v23 }
0x1159   :  { %v1086_v49 = vmax.f32 %v1052_v45, 0.0 }
0x115a   :  { %v1421_v55 = vpop.f32.mrb[14].mxu0  ;;  %v1085_v46 = vmax.f32 %v1047_v44, 0.0 }
0x115b   :  { %v1056_v24 = vpop.f32.mrb[15].mxu0  ;;  %v1062_v50 = vadd.f32 %v1421_v55, %v1755_v43 }
0x115c   :  { %v1057_v47 = vadd.f32 %v1755_v43, %v1056_v24 }
0x115d   :  { %v1088_v53 = vmax.f32 %v1062_v50, 0.0 }
0x115e   :  { %v1424_v2 = vpop.f32.mrb[16].mxu0  ;;  %v1087_v51 = vmax.f32 %v1057_v47, 0.0 }
0x115f   :  { %v1536_v13 = vpop.eup %1535  ;;  %v1066_v25 = vpop.f32.mrb[17].mxu0  ;;  %v1072_v54 = vadd.f32 %v1424_v2, %v1755_v43 }
0x1160   :  { %856 = vrot.lane.b32.xlu1 %v1536_v13, %s1554_s28  ;;  %v1067_v52 = vadd.f32 %v1755_v43, %v1066_v25 }
0x1161   :  { %v1538_v27 = vpop.eup %1537  ;;  %v1090_v57 = vmax.f32 %v1072_v54, 0.0 }
0x1162   :  { %v850_v28 = vadd.f32 1.0, %v1538_v27  ;;  %v1089_v56 = vmax.f32 %v1067_v52, 0.0 }
0x1164   :  { %1539 = vrcp.f32 %v850_v28 }
0x116e   :  { %v1540_v29 = vpop.eup %1539 }
0x116f   :  { %v854_v32 = vmul.f32 %v1540_v29, %v764_v9 }
0x11d2   :  { %v857_v30 = vpop.permute.xlu1 %856 }
0x11d3   :  { %v859_v31 = vmul.f32 %v1540_v29, %v857_v30 }
0x11d5   :  { %861 = vrot.lane.b32.xlu0 %v859_v31, %s1555_s4 }
0x1247   :  { %v862_v34 = vpop.permute.xlu0 %861 }
0x1248   :  { %v1741_v35 = vadd.f32 %v862_v34, %v854_v32 }
0x124a   :  { %1541 = vtanh.f32 %v1741_v35 }
0x1254   :  { %v1542_v36 = vpop.eup %1541 }
0x1255   :  { %867 = vrot.lane.b32.xlu1 %v1542_v36, %s1556_s1 }
0x12c7   :  { %v868_v41 = vpop.permute.xlu1 %867 }
0x12c8   :  { %v870_v42 = vmul.f32 %v1540_v29, %v868_v41 }
0x12ca   :  { %872 = vrot.lane.b32.xlu0 %v870_v42, %s1557_s5 }
0x133c   :  { %v873_v48 = vpop.permute.xlu0 %872 }
0x133d   :  { %1410 = vmatmul.mubr.msk.f32.vlgmr.msra.gmra.mrb[10].mxu1 %vm37_vm0, %v873_v48  ;;  %1425 = vmatprep.mubr.msk.f32.mxu0 %vm37_vm0, %v873_v48 }
0x133e   :  { %1479 = vmatpush3.bf16.msra.mxu1 %v1476_v40  ;;  %1432 = vmatprep.mubr.msk.f32.mxu1 %vm37_vm0, %v1085_v46 }
0x1341   :  { %1433 = vmatmul.mubr.msk.f32.vlgmr.msra.gmra.mrb[12].mxu1 %vm37_vm0, %v1086_v49 }
0x1342   :  { %1435 = vmatprep.mubr.msk.f32.mxu1 %vm37_vm0, %v1087_v51 }
0x1345   :  { %1436 = vmatmul.mubr.msk.f32.gmra.mrb[14].mxu1 %vm37_vm0, %v1088_v53 }
0x1346   :  { %1438 = vmatprep.mubr.msk.f32.mxu1 %vm37_vm0, %v1089_v56 }
0x1349   :  { %1439 = vmatmul.mubr.msk.f32.gmra.mrb[16].mxu1 %vm37_vm0, %v1090_v57 }
0x1410   :  { %v942_v59 = vpop.f32.mrb[10].mxu1 }
0x1411   :  { %v946_v60 = vadd.f32 %v942_v59, %v164_v58  ;;  %v1411_v61 = vpop.f32.mrb[11].mxu1 }
0x1413   :  { %1543 = vtanh.f32 %v946_v60  ;;  %v1267_v12 = vmul.f32 -1.442695, %v946_v60 }
0x1414   :  { %v1434_v63 = vpop.f32.mrb[12].mxu1 }
0x1415   :  { %v1193_v0 = vadd.f32 %v1434_v63, %v1277_v62  ;;  %v1187_v1 = vpop.f32.mrb[13].mxu1  ;;  %1545 = vpow2.f32 %v1267_v12 }
0x1416   :  { %v1188_v3 = vadd.f32 %v1277_v62, %v1187_v1 }
0x1417   :  { %1227 = vst [vmem:[%s1817_s3 + $0x8] sm:$0xff] %v1193_v0 }
0x1418   :  { %1226 = vst [vmem:[%s1817_s3] sm:$0xff] %v1188_v3  ;;  %v1437_v11 = vpop.f32.mrb[14].mxu1 }
0x1419   :  { %v1203_v37 = vadd.f32 %v1437_v11, %v1277_v62  ;;  %v1197_v5 = vpop.f32.mrb[15].mxu1 }
0x141a   :  { %v1198_v6 = vadd.f32 %v1277_v62, %v1197_v5 }
0x141b   :  { %1229 = vst [vmem:[%s1817_s3 + $0x18] sm:$0xff] %v1203_v37 }
0x141c   :  { %1228 = vst [vmem:[%s1817_s3 + $0x10] sm:$0xff] %v1198_v6  ;;  %v1440_v8 = vpop.f32.mrb[16].mxu1 }
0x141d   :  { %v1544_v4 = vpop.eup %1543  ;;  %v1213_v7 = vadd.f32 %v1440_v8, %v1277_v62  ;;  %v1207_v9 = vpop.f32.mrb[17].mxu1 }
0x141e   :  { %v1208_v10 = vadd.f32 %v1277_v62, %v1207_v9  ;;  %956 = vrot.lane.b32.xlu1 %v1544_v4, %s1554_s28 }
0x141f   :  { %1231 = vst [vmem:[%s1817_s3 + $0x28] sm:$0xff] %v1213_v7  ;;  %v1546_v14 = vpop.eup %1545 }
0x1420   :  { %1230 = vst [vmem:[%s1817_s3 + $0x20] sm:$0xff] %v1208_v10  ;;  %v950_v15 = vadd.f32 1.0, %v1546_v14 }
0x1422   :  { %1547 = vrcp.f32 %v950_v15 }
0x142c   :  { %v1548_v16 = vpop.eup %1547 }
0x142d   :  { %v954_v19 = vmul.f32 %v1548_v16, %v1741_v35 }
0x1490   :  { %v957_v17 = vpop.permute.xlu1 %956 }
0x1491   :  { %v959_v18 = vmul.f32 %v1548_v16, %v957_v17 }
0x1493   :  { %961 = vrot.lane.b32.xlu0 %v959_v18, %s1555_s4 }
0x1505   :  { %v962_v20 = vpop.permute.xlu0 %961 }
0x1506   :  { %v964_v21 = vadd.f32 %v962_v20, %v954_v19 }
0x1508   :  { %1549 = vtanh.f32 %v964_v21 }
0x1512   :  { %v1550_v22 = vpop.eup %1549 }
0x1513   :  { %967 = vrot.lane.b32.xlu1 %v1550_v22, %s1556_s1 }
0x1585   :  { %v968_v33 = vpop.permute.xlu1 %967 }
0x1586   :  { %v970_v23 = vmul.f32 %v1548_v16, %v968_v33 }
0x1588   :  { %976 = vrot.lane.b32.xlu0 %v970_v23, %s1557_s5 }
0x15fa   :  { %v977_v55 = vpop.permute.xlu0 %976 }
0x15fb   :  { %v1235_v24 = vsel %vm37_vm0, %v977_v55, %v964_v21  ;;  %1426 = vmatmul.mubr.msk.f32.gmra.mrb[18].mxu0 %vm37_vm0, %v977_v55 }
0x15fc   :  { %v1237_v2 = vsel %vm1236_vm2, %v1235_v24, 0.0 }
0x15fd   :  { %1238 = vst [vmem:[%s1817_s3 + $0x40] sm:$0xff] %v1237_v2 }
0x16ce   :  { %v1427_v13 = vpop.f32.mrb[18].mxu0 }
0x16cf   :  { %v1082_v25 = vadd.f32 %v1427_v13, %v1755_v43  ;;  %v1076_v26 = vpop.f32.mrb[19].mxu0 }
0x16d0   :  { %v1077_v27 = vadd.f32 %v1755_v43, %v1076_v26 }
0x16d1   :  { %v1092_v29 = vmax.f32 %v1082_v25, 0.0 }
0x16d2   :  { %v1091_v28 = vmax.f32 %v1077_v27, 0.0 }
0x16d4   :  { %1441 = vmatprep.mubr.msk.f32.mxu1 %vm37_vm0, %v1091_v28 }
0x16d5   :  { %1442 = vmatmul.mubr.msk.f32.gmra.mrb[18].mxu1 %vm37_vm0, %v1092_v29 }
0x17a8   :  { %v1443_v30 = vpop.f32.mrb[18].mxu1 }
0x17a9   :  { %v1223_v31 = vadd.f32 %v1443_v30, %v1277_v62  ;;  %v1217_v32 = vpop.f32.mrb[19].mxu1 }
0x17aa   :  { %v1218_v34 = vadd.f32 %v1277_v62, %v1217_v32 }
0x17ab   :  { %1233 = vst [vmem:[%s1817_s3 + $0x38] sm:$0xff] %v1223_v31 }
0x17ac   :  { %1232 = vst [vmem:[%s1817_s3 + $0x30] sm:$0xff] %v1218_v34 }

</bundles_post_ra>
